<compile_context>
chip_gen: v6e
topology: v6e:2x2x1
jax: 0.10.0
libtpu: 0.0.40
codegen_flags: <defaults>
</compile_context>

<pallas_src>
import functools
import math
from typing import NamedTuple

import jax
import jax.numpy as jnp
from jax.experimental import pallas as pl
from jax.experimental.pallas import tpu as pltpu


def _gaussian_kernel1d(ksize: int = 3, sigma: float = 1.0):
    """Reproduce torchvision's 1-D gaussian kernel (GaussianBlur(3, sigma=1.0))."""
    half = (ksize - 1) * 0.5
    pdf = [math.exp(-0.5 * ((-half + i) / sigma) ** 2) for i in range(ksize)]
    s = sum(pdf)
    return tuple(p / s for p in pdf)


_K1D = _gaussian_kernel1d(3, 1.0)                       # separable weights
_K2D = [[ky * kx for kx in _K1D] for ky in _K1D]        # 2-D kernel (reference fn)


class _ChipCfg(NamedTuple):
    vmem_limit_bytes: int     # scoped VMEM limit we request
    block_target_bytes: int   # per-step I/O block byte target (DMA sweet spot)
    min_grid_steps: int       # minimum grid steps before shrinking the block
    bf16_compute_ok: bool     # chip has a bf16 VPU


@functools.lru_cache(maxsize=1)
def _chip_config() -> _ChipCfg:
    kind = ""
    try:
        kind = jax.devices()[0].device_kind.lower()
    except Exception:
        pass
    if "v7" in kind:
        # 64 MiB physical VMEM, 2 TensorCores/chip, 3.2 TB/s HBM.
        return _ChipCfg(44 << 20, 2 << 20, 8, True)
    if "v6" in kind:
        return _ChipCfg(64 << 20, 4 << 20, 1, True)
    if "v5e" in kind or "v5 lite" in kind or "v5litepod" in kind:
        return _ChipCfg(64 << 20, 4 << 20, 1, False)
    # Unknown / older chip: conservative defaults.
    return _ChipCfg(32 << 20, 2 << 20, 2, False)


def _round_down(v: int, m: int) -> int:
    return (v // m) * m


# ---------------------------------------------------------------------------
# Kernel bodies
# ---------------------------------------------------------------------------

def _tap3_reflect(x, k1d, shift, axis, first_mask, last_mask):
    """3-tap convolution along `axis` with reflect boundary handling.

    prev/nxt are `x` rotated by +/-shift (non-negative rotate amounts only).
    Positions where the rotate wrapped around (or crossed a logical row boundary
    in the flattened layout) are exactly the positions selected by
    first_mask/last_mask and are replaced with the reflected neighbour.
    """
    n = x.shape[axis]
    prev_raw = pltpu.roll(x, shift, axis)          # value at index i - shift
    next_raw = pltpu.roll(x, n - shift, axis)      # value at index i + shift
    prev = jnp.where(first_mask, next_raw, prev_raw)   # reflect: pad[-1] = x[1]
    nxt = jnp.where(last_mask, prev_raw, next_raw)     # reflect: pad[n] = x[n-2]
    return k1d[0] * prev + k1d[1] * x + k1d[2] * nxt


def _blur_flat_kernel(x_ref, o_ref, *, H, W, k1d, compute_dtype):
    # x_ref/o_ref: (P, H*W) -- each row is one (image, channel) plane, lane-dense.
    x = x_ref[...].astype(compute_dtype)           # single load + single cast
    L = H * W
    idx = jax.lax.broadcasted_iota(jnp.int32, (1, L), 1)
    if (W & (W - 1)) == 0:
        col = idx & (W - 1)                         # cheaper than % for pow2 W
    else:
        col = idx % W
    # vertical 3-tap: neighbouring rows are +/-W apart in the flat layout
    v = _tap3_reflect(x, k1d, W, 1, idx < W, idx >= (H - 1) * W)
    # horizontal 3-tap
    out = _tap3_reflect(v, k1d, 1, 1, col == 0, col == W - 1)
    o_ref[...] = out.astype(o_ref.dtype)


def _blur_plane_kernel(x_ref, o_ref, *, rows_per_chunk, k1d, compute_dtype):
    # x_ref/o_ref: (P, H, W) -- used for large planes (W >= 128, lane-dense).
    P, H, W = x_ref.shape
    cdt = compute_dtype
    k0, k1, k2 = k1d

    col = jax.lax.broadcasted_iota(jnp.int32, (1, 1, W), 2)
    first_col = col == 0
    last_col = col == W - 1

    if rows_per_chunk >= H:
        # Whole plane per step: temporaries are small at this plane size.
        x = x_ref[...].astype(cdt)
        row = jax.lax.broadcasted_iota(jnp.int32, (1, H, 1), 1)
        v = _tap3_reflect(x, k1d, 1, 1, row == 0, row == H - 1)       # vertical
        out = _tap3_reflect(v, k1d, 1, 2, first_col, last_col)        # horizontal
        o_ref[...] = out.astype(o_ref.dtype)
        return

    # Chunk the compute over H so live temporaries stay ~5 * chunk bytes even
    # when the (whole-plane) DMA block is large.  The wrapper guarantees
    # rows_per_chunk % 8 == 0 and rows_per_chunk | H.
    th = rows_per_chunk
    n_chunks = H // th
    row = jax.lax.broadcasted_iota(jnp.int32, (1, th, 1), 1)
    top_row = row == 0
    bot_row = row == th - 1

    def chunk_body(c, above_carry):
        h0 = pl.multiple_of(c * th, 8)
        x = x_ref[:, pl.ds(h0, th), :].astype(cdt)

        # Row just above the chunk (global row h0-1).  First chunk: reflect
        # padding maps it to global row 1 == chunk row 1.  Otherwise it is the
        # previous chunk's last row, carried through the loop.
        above = jnp.where(c == 0, x[:, 1:2, :], above_carry)

        # Row just below the chunk (global row h0+th).  Last chunk: reflect
        # padding maps it to global row H-2 == chunk row th-2.  Otherwise it is
        # the first row of the next chunk (aligned 8-row read, first row kept).
        below_off = pl.multiple_of(jnp.minimum(h0 + th, H - th), 8)
        below_next = x_ref[:, pl.ds(below_off, 8), :][:, :1, :].astype(cdt)
        below = jnp.where(c == n_chunks - 1, x[:, th - 2:th - 1, :], below_next)

        prev = jnp.where(top_row, above, pltpu.roll(x, 1, 1))
        nxt = jnp.where(bot_row, below, pltpu.roll(x, th - 1, 1))
        v = k0 * prev + k1 * x + k2 * nxt                        # vertical 3-tap
        out = _tap3_reflect(v, k1d, 1, 2, first_col, last_col)   # horizontal 3-tap

        o_ref[:, pl.ds(h0, th), :] = out.astype(o_ref.dtype)
        return x[:, th - 1:th, :]          # becomes the next chunk's "above" row

    jax.lax.fori_loop(0, n_chunks, chunk_body, jnp.zeros((P, 1, W), cdt))


# ---------------------------------------------------------------------------
# Block / chunk sizing
# ---------------------------------------------------------------------------

def _flat_planes_per_block(M, L, io_bytes, compute_bytes, cfg):
    sub = max(8, 32 // io_bytes)                   # packed-sublane tile (8 f32, 16 bf16)
    if M <= sub:
        return M
    plane_io = L * io_bytes
    # VMEM model: double-buffered in+out blocks (4x) plus ~5 block-sized
    # compute-dtype temporaries (loaded block, rolls, selects, vertical pass).
    per_plane_vmem = L * (4 * io_bytes + 5 * compute_bytes)
    p = min(max(1, cfg.block_target_bytes // plane_io),
            max(1, int(cfg.vmem_limit_bytes * 0.7) // per_plane_vmem))
    p = _round_down(max(p, sub), sub)
    if cfg.min_grid_steps > 1:
        # Keep several pipeline steps per TensorCore on multi-TC chips, but
        # never drop below one sublane group.
        p = min(p, max(sub, _round_down(M // cfg.min_grid_steps, sub)))
    return M if p >= M else p


def _plane_rows_per_chunk(H, W, compute_bytes, override=None):
    if override is not None:
        if override >= H:
            return H
        if override % 8 == 0 and H % override == 0:
            return override
        return H
    # Whole-plane temporaries small enough -> no chunking machinery.
    if 5 * H * W * compute_bytes <= (2 << 20):
        return H
    # ~1 MiB of live chunk temporaries.
    target = max(8, _round_down((1 << 20) // (5 * W * compute_bytes), 8))
    target = min(target, _round_down(H, 8))
    if target < 8:
        return H
    for th in range(target, 7, -8):
        if H % th == 0:
            return th
    # H has no multiple-of-8 divisor <= target; fall back to whole-plane compute.
    # TODO(synk): grid-level H-stripe tiling with a 1-row halo for planes whose
    # double-buffered in+out blocks alone exceed the VMEM limit (>= 2048^2 f32).
    return H


def _plane_planes_per_block(M, H, W, io_bytes, compute_bytes, th, cfg):
    plane_io = H * W * io_bytes
    per_plane_vmem = 4 * plane_io + 5 * th * W * compute_bytes
    p = min(max(1, cfg.block_target_bytes // plane_io),
            max(1, int(cfg.vmem_limit_bytes * 0.7) // per_plane_vmem))
    if cfg.min_grid_steps > 1:
        p = min(p, max(1, M // cfg.min_grid_steps))
    return max(1, min(p, M))


# ---------------------------------------------------------------------------
# Public entry point
# ---------------------------------------------------------------------------

def blur(x, *, flat_planes_per_block=None, plane_rows_per_chunk=None):
    """x: (N, C, H, W) -> (N, C, H, W), 3x3 Gaussian blur per channel, reflect pad."""
    N, C, H, W = x.shape
    assert H >= 2 and W >= 2, "reflect padding needs H, W >= 2"
    M = N * C
    L = H * W

    cfg = _chip_config()
    io_bytes = x.dtype.itemsize
    compute_dtype = (jnp.bfloat16
                     if (x.dtype == jnp.bfloat16 and cfg.bf16_compute_ok)
                     else jnp.float32)
    compute_bytes = jnp.dtype(compute_dtype).itemsize

    cparams = pltpu.CompilerParams(
        dimension_semantics=("parallel",),          # shard plane-blocks over TCs
        vmem_limit_bytes=cfg.vmem_limit_bytes,
    )
    # Pure bandwidth-bound kernel: ~10 flops/elem, read + write once.
    cost = pl.CostEstimate(flops=10 * int(x.size), transcendentals=0,
                           bytes_accessed=2 * int(x.size) * io_bytes)

    sub = max(8, 32 // io_bytes)
    use_flat = W < 128
    if use_flat and min(M, sub) * L * io_bytes > cfg.block_target_bytes:
        # Rare: narrow but enormous planes; fall back to the (P, H, W) path.
        use_flat = False

    if use_flat:
        # Small-width planes: flatten each plane so the last (lane) dim is H*W,
        # avoiding masked partial stores.
        P = (flat_planes_per_block if flat_planes_per_block is not None
             else _flat_planes_per_block(M, L, io_bytes, compute_bytes, cfg))
        P = min(P, M)
        out = pl.pallas_call(
            functools.partial(_blur_flat_kernel, H=H, W=W, k1d=_K1D,
                              compute_dtype=compute_dtype),
            out_shape=jax.ShapeDtypeStruct((M, L), x.dtype),
            grid=(pl.cdiv(M, P),),
            in_specs=[pl.BlockSpec((P, L), lambda i: (i, 0))],
            out_specs=pl.BlockSpec((P, L), lambda i: (i, 0)),
            compiler_params=cparams,
            cost_estimate=cost,
        )(x.reshape(M, L))
    else:
        # Wide planes: (planes, H, W) blocks (W >= 128 so stores are lane-dense);
        # compute is chunked over H inside the body to bound temporaries.
        th = _plane_rows_per_chunk(H, W, compute_bytes, plane_rows_per_chunk)
        P = _plane_planes_per_block(M, H, W, io_bytes, compute_bytes, th, cfg)
        out = pl.pallas_call(
            functools.partial(_blur_plane_kernel, rows_per_chunk=th, k1d=_K1D,
                              compute_dtype=compute_dtype),
            out_shape=jax.ShapeDtypeStruct((M, H, W), x.dtype),
            grid=(pl.cdiv(M, P),),
            in_specs=[pl.BlockSpec((P, H, W), lambda i: (i, 0, 0))],
            out_specs=pl.BlockSpec((P, H, W), lambda i: (i, 0, 0)),
            compiler_params=cparams,
            cost_estimate=cost,
        )(x.reshape(M, H, W))

    return out.reshape(N, C, H, W)


def _reference_blur(x):
    """Plain-JAX 9-tap reference (same math) for correctness checks."""
    N, C, H, W = x.shape
    xp = jnp.pad(x, ((0, 0), (0, 0), (1, 1), (1, 1)), mode="reflect").astype(jnp.float32)
    acc = jnp.zeros((N, C, H, W), jnp.float32)
    for di in range(3):
        for dj in range(3):
            acc = acc + _K2D[di][dj] * xp[:, :, di:di + H, dj:dj + W]
    return acc.astype(x.dtype)


if __name__ == "__main__":
    key = jax.random.PRNGKey(0)

    # Primary shape implied by the module: NCHW (2, 4, 16, 16) -> flat path.
    x = jax.random.normal(key, (2, 4, 16, 16), dtype=jnp.float32)
    y = jax.block_until_ready(blur(x))
    assert y.shape == x.shape and y.dtype == x.dtype
    assert jnp.allclose(y, _reference_blur(x), atol=1e-5, rtol=1e-5)

    # Ragged grid on the flat path (M = 12 planes, forced 8-plane blocks).
    x2 = jax.random.normal(jax.random.PRNGKey(1), (1, 12, 16, 16), dtype=jnp.float32)
    y2 = jax.block_until_ready(blur(x2, flat_planes_per_block=8))
    assert jnp.allclose(y2, _reference_blur(x2), atol=1e-5, rtol=1e-5)

    # Lane-dense (P, H, W) plane path (W >= 128), whole-plane body.
    x3 = jax.random.normal(jax.random.PRNGKey(2), (1, 2, 16, 128), dtype=jnp.float32)
    y3 = jax.block_until_ready(blur(x3))
    assert jnp.allclose(y3, _reference_blur(x3), atol=1e-5, rtol=1e-5)

    # Plane path with in-body H-chunking (forced 8-row chunks -> 4 chunks).
    x4 = jax.random.normal(jax.random.PRNGKey(3), (1, 2, 32, 128), dtype=jnp.float32)
    y4 = jax.block_until_ready(blur(x4, plane_rows_per_chunk=8))
    assert jnp.allclose(y4, _reference_blur(x4), atol=1e-5, rtol=1e-5)

    # bf16 input: on v6e/v7x the taps run in bf16 (wider tolerance covers the
    # ~2^-8 per-op rounding of the low-precision accumulation).
    xb = x.astype(jnp.bfloat16)
    yb = jax.block_until_ready(blur(xb))
    assert yb.dtype == jnp.bfloat16
    assert jnp.allclose(yb.astype(jnp.float32),
                        _reference_blur(xb).astype(jnp.float32),
                        atol=1e-1, rtol=1e-1)

    print("KERNEL_OK")
</pallas_src>

<mosaic_0001>
module attributes {stable_mosaic.version = 11 : i64} {
  func.func @_blur_flat_kernel(%arg0: i32, %arg1: memref<8x256xf32, #tpu.memory_space<vmem>>, %arg2: memref<8x256xf32, #tpu.memory_space<vmem>>) attributes {dimension_semantics = [#tpu.dimension_semantics<parallel>], iteration_bounds = array<i64: 1>, scalar_prefetch = 0 : i64, scratch_operands = 0 : i64, tpu.core_type = #tpu.core_type<tc>, window_params = [{transform_indices = @transform_0, window_bounds = array<i64: 8, 256>}, {transform_indices = @transform_1, window_bounds = array<i64: 8, 256>}]} {
    %c0 = arith.constant 0 : index
    %c0_0 = arith.constant 0 : index
    %0 = vector.load %arg1[%c0, %c0_0] : memref<8x256xf32, #tpu.memory_space<vmem>>, vector<8x256xf32>
    %1 = tpu.iota {dimensions = array<i32: 1>} : vector<1x256xi32>
    %c15_i32 = arith.constant 15 : i32
    %2 = vector.broadcast %c15_i32 : i32 to vector<1x256xi32>
    %3 = arith.andi %1, %2 : vector<1x256xi32>
    %c16_i32 = arith.constant 16 : i32
    %4 = vector.broadcast %c16_i32 : i32 to vector<1x256xi32>
    %5 = arith.cmpi slt, %1, %4 : vector<1x256xi32>
    %c240_i32 = arith.constant 240 : i32
    %6 = vector.broadcast %c240_i32 : i32 to vector<1x256xi32>
    %7 = arith.cmpi sge, %1, %6 : vector<1x256xi32>
    %c16_i32_1 = arith.constant 16 : i32
    %8 = tpu.dynamic_rotate %0 by %c16_i32_1 dim 1 : vector<8x256xf32>, i32 -> vector<8x256xf32>
    %c240_i32_2 = arith.constant 240 : i32
    %9 = tpu.dynamic_rotate %0 by %c240_i32_2 dim 1 : vector<8x256xf32>, i32 -> vector<8x256xf32>
    %10 = vector.shape_cast %5 : vector<1x256xi1> to vector<1x256xi1>
    %11 = vector.broadcast %10 : vector<1x256xi1> to vector<8x256xi1>
    %12 = arith.select %11, %9, %8 : vector<8x256xi1>, vector<8x256xf32>
    %13 = vector.shape_cast %7 : vector<1x256xi1> to vector<1x256xi1>
    %14 = vector.broadcast %13 : vector<1x256xi1> to vector<8x256xi1>
    %15 = arith.select %14, %8, %9 : vector<8x256xi1>, vector<8x256xf32>
    %cst = arith.constant 0.274068624 : f32
    %16 = vector.broadcast %cst : f32 to vector<8x256xf32>
    %17 = arith.mulf %16, %12 : vector<8x256xf32>
    %cst_3 = arith.constant 0.451862752 : f32
    %18 = vector.broadcast %cst_3 : f32 to vector<8x256xf32>
    %19 = arith.mulf %18, %0 : vector<8x256xf32>
    %20 = arith.addf %17, %19 : vector<8x256xf32>
    %cst_4 = arith.constant 0.274068624 : f32
    %21 = vector.broadcast %cst_4 : f32 to vector<8x256xf32>
    %22 = arith.mulf %21, %15 : vector<8x256xf32>
    %23 = arith.addf %20, %22 : vector<8x256xf32>
    %c0_i32 = arith.constant 0 : i32
    %24 = vector.broadcast %c0_i32 : i32 to vector<1x256xi32>
    %25 = arith.cmpi eq, %3, %24 : vector<1x256xi32>
    %c15_i32_5 = arith.constant 15 : i32
    %26 = vector.broadcast %c15_i32_5 : i32 to vector<1x256xi32>
    %27 = arith.cmpi eq, %3, %26 : vector<1x256xi32>
    %c1_i32 = arith.constant 1 : i32
    %28 = tpu.dynamic_rotate %23 by %c1_i32 dim 1 : vector<8x256xf32>, i32 -> vector<8x256xf32>
    %c255_i32 = arith.constant 255 : i32
    %29 = tpu.dynamic_rotate %23 by %c255_i32 dim 1 : vector<8x256xf32>, i32 -> vector<8x256xf32>
    %30 = vector.shape_cast %25 : vector<1x256xi1> to vector<1x256xi1>
    %31 = vector.broadcast %30 : vector<1x256xi1> to vector<8x256xi1>
    %32 = arith.select %31, %29, %28 : vector<8x256xi1>, vector<8x256xf32>
    %33 = vector.shape_cast %27 : vector<1x256xi1> to vector<1x256xi1>
    %34 = vector.broadcast %33 : vector<1x256xi1> to vector<8x256xi1>
    %35 = arith.select %34, %28, %29 : vector<8x256xi1>, vector<8x256xf32>
    %cst_6 = arith.constant 0.274068624 : f32
    %36 = vector.broadcast %cst_6 : f32 to vector<8x256xf32>
    %37 = arith.mulf %36, %32 : vector<8x256xf32>
    %cst_7 = arith.constant 0.451862752 : f32
    %38 = vector.broadcast %cst_7 : f32 to vector<8x256xf32>
    %39 = arith.mulf %38, %23 : vector<8x256xf32>
    %40 = arith.addf %37, %39 : vector<8x256xf32>
    %cst_8 = arith.constant 0.274068624 : f32
    %41 = vector.broadcast %cst_8 : f32 to vector<8x256xf32>
    %42 = arith.mulf %41, %35 : vector<8x256xf32>
    %43 = arith.addf %40, %42 : vector<8x256xf32>
    %c0_9 = arith.constant 0 : index
    %c0_10 = arith.constant 0 : index
    %44 = vector.load %arg2[%c0_9, %c0_10] : memref<8x256xf32, #tpu.memory_space<vmem>>, vector<8x256xf32>
    tpu.vector_store %arg2[%c0_9, %c0_10], %43 {strides = array<i32>} : memref<8x256xf32, #tpu.memory_space<vmem>>, vector<8x256xf32>,
    return
  }
  func.func @transform_0(%arg0: i32) -> (i32, i32) {
    %c0_i32 = arith.constant 0 : i32
    %c0_i32_0 = arith.constant 0 : i32
    return %arg0, %c0_i32 : i32, i32
  }
  func.func @transform_1(%arg0: i32) -> (i32, i32) {
    %c0_i32 = arith.constant 0 : i32
    %c0_i32_0 = arith.constant 0 : i32
    return %arg0, %c0_i32 : i32, i32
  }
}

</mosaic_0001>

<bundles_post_ra>
// kernel: tpu_custom_call.1
= control target key start
LH: loop header
LB: loop body
LE: loop exit
PB: predicated region body
PF: predicated region fallthrough
CT: control target
= control target key end

     0   :  { %6 = vsyncpa [#allocation3], 0  ;;  %s208_s0 = inlined_call_operand.hbm [shape: f32[8,256], index: 0, kind: input, shape index: {}]   ;;  %s209_s1 = inlined_call_operand.hbm [shape: f32[8,256], index: 1, kind: output, shape index: {}]  }
   0x1   :  { %7 = vsyncpa [#allocation4], 0  ;;  %s174_s6 = smov [#allocation2]  }
   0x2   :  { %s14_s7 = sshll.u32 %s174_s6, 4  ;;  %s15_s7 = int_to_ptr.vmem [resolvable:$true] %s14_s7 }
   0x3   :  { %s138_s8 = scalar_lea.vmem %s15_s7, 256  ;;  %p143_p1 = scmp.lt.s32.totalorder %s15_s7, %s15_s7 }
   0x4   :  { %p139_p0 = scmp.ne.s32.totalorder %s15_s7, %s138_s8  ;;  %p144_p2 = scmp.lt.s32.totalorder %s138_s8, %s138_s8 }
   0x6   :  { %p145_p3 = por %p144_p2, %p143_p1 }
   0x8   :  { %p146_p4 = pnand %p145_p3, %p139_p0 }
   0xa   :  { %149 = shalt.err (!%p146_p4)
}
   0xb   :  { %17 = dma.hbm_to_vmem [thread:$0]  %s208_s0, 256, %s15_s7, [#allocation3]  }
   0xc   :  { %170 = dma.done.wait [#allocation3], 256  }
   0xd   :  { %171 = vsyncadd [#allocation3], 4294967040  ;;  %v21_v0 = vld [vmem:[#allocation2] sm:$0xff]  ;;  %s175_s11 = smov 112   ;;  %s176_s12 = smov 16   ;;  %v22_v1 = vld [vmem:[#allocation2 + $0x8] sm:$0xff]  ;;  %v23_v2 = vlaneseq }
   0xe   :  { %38 = vrot.lane.b32.xlu1 %v21_v0, %s175_s11  ;;  %32 = vrot.lane.b32.xlu0 %v21_v0, %s176_s12  ;;  %v59_v7 = vmul.f32 0.45186275, %v21_v0  ;;  %v60_v8 = vmul.f32 0.45186275, %v22_v1  ;;  %s177_s0 = smov 1   ;;  %s178_s13 = smov 127  }
   0xf   :  { %v24_v3 = vand.u32 127, %v23_v2  ;;  %s179_s14 = smov [#allocation5]  }
  0x10   :  { %s115_s15 = sshll.u32 %s179_s14, 4  ;;  %s116_s15 = int_to_ptr.vmem [resolvable:$true] %s115_s15 }
  0x11   :  { %v25_v4 = vadd.s32 128, %v24_v3  ;;  %vm42_vm0 = vcmp.lt.s32.totalorder %v24_v3, 112  ;;  %vm28_vm1 = vcmp.lt.s32.totalorder %v24_v3, 16  ;;  %v26_v26 = vand.u32 15, %v24_v3  ;;  %s150_s16 = scalar_lea.vmem %s116_s15, 256  ;;  %p155_p6 = scmp.lt.s32.totalorder %s116_s15, %s116_s15 }
  0x12   :  { %40 = vrot.lane.b32.xlu1 %v22_v1, %s175_s11  ;;  %34 = vrot.lane.b32.xlu0 %v22_v1, %s176_s12  ;;  %vm75_vm3 = vcmp.lt.s32.totalorder %v24_v3, 1  ;;  %vm82_vm4 = vcmp.lt.s32.totalorder %v24_v3, 127  ;;  %p151_p5 = scmp.ne.s32.totalorder %s116_s15, %s150_s16  ;;  %p156_p7 = scmp.lt.s32.totalorder %s150_s16, %s150_s16 }
  0x13   :  { %vm31_vm2 = vcmp.ge.s32.totalorder %v25_v4, 240  ;;  %v27_v27 = vand.u32 15, %v25_v4  ;;  %vm67_vm5 = vcmp.eq.s32.totalorder %v26_v26, 0  ;;  %vm193_vm7 = vcmp.eq.s32.totalorder %v26_v26, 15 }
  0x14   :  { %p157_p8 = por %p156_p7, %p155_p6 }
  0x15   :  { %vm68_vm6 = vcmp.eq.s32.totalorder %v27_v27, 0  ;;  %vm197_vm8 = vcmp.eq.s32.totalorder %v27_v27, 15 }
  0x16   :  { %p158_p9 = pnand %p157_p8, %p151_p5 }
  0x80   :  { %v39_v5 = vpop.permute.xlu1 %38  ;;  %v33_v6 = vpop.permute.xlu0 %32 }
  0x84   :  { %v41_v9 = vpop.permute.xlu1 %40  ;;  %v35_v10 = vpop.permute.xlu0 %34 }
  0x85   :  { %v43_v11 = vsel %vm42_vm0, %v39_v5, %v41_v9  ;;  %v44_v12 = vsel %vm42_vm0, %v41_v9, %v39_v5  ;;  %v36_v13 = vsel %vm28_vm1, %v33_v6, %v35_v10  ;;  %v37_v14 = vsel %vm28_vm1, %v35_v10, %v33_v6 }
  0x86   :  { %v49_v15 = vsel %vm28_vm1, %v43_v11, %v37_v14  ;;  %v56_v16 = vsel %vm31_vm2, %v36_v13, %v44_v12  ;;  %v58_v17 = vmul.f32 0.27406862, %v36_v13  ;;  %v63_v21 = vmul.f32 0.27406862, %v43_v11 }
  0x87   :  { %v57_v18 = vmul.f32 0.27406862, %v49_v15  ;;  %v64_v19 = vmul.f32 0.27406862, %v56_v16 }
  0x88   :  { %v62_v20 = vadd.f32 %v60_v8, %v58_v17 }
  0x89   :  { %v61_v22 = vadd.f32 %v59_v7, %v57_v18 }
  0x8a   :  { %v66_v23 = vadd.f32 %v64_v19, %v62_v20 }
  0x8b   :  { %v65_v24 = vadd.f32 %v63_v21, %v61_v22 }
  0x8c   :  { %73 = vrot.lane.b32.xlu1 %v66_v23, %s177_s0  ;;  %v100_v32 = vmul.f32 0.45186275, %v66_v23 }
  0x8d   :  { %71 = vrot.lane.b32.xlu0 %v65_v24, %s177_s0  ;;  %v99_v44 = vmul.f32 0.45186275, %v65_v24 }
  0x90   :  { %80 = vrot.lane.b32.xlu1 %v66_v23, %s178_s13 }
  0x91   :  { %78 = vrot.lane.b32.xlu0 %v65_v24, %s178_s13 }
  0xfe   :  { %v74_v25 = vpop.permute.xlu1 %73 }
  0xff   :  { %v72_v28 = vpop.permute.xlu0 %71 }
 0x100   :  { %v76_v34 = vsel %vm75_vm3, %v72_v28, %v74_v25  ;;  %v77_v35 = vsel %vm75_vm3, %v74_v25, %v72_v28 }
 0x102   :  { %v81_v29 = vpop.permute.xlu1 %80 }
 0x103   :  { %v79_v33 = vpop.permute.xlu0 %78 }
 0x104   :  { %v83_v36 = vsel %vm82_vm4, %v79_v33, %v81_v29  ;;  %v84_v37 = vsel %vm82_vm4, %v81_v29, %v79_v33 }
 0x105   :  { %v89_v38 = vsel %vm67_vm5, %v83_v36, %v77_v35  ;;  %v90_v39 = vsel %vm68_vm6, %v84_v37, %v76_v34  ;;  %v95_v40 = vsel %vm193_vm7, %v77_v35, %v83_v36  ;;  %v96_v41 = vsel %vm197_vm8, %v76_v34, %v84_v37 }
 0x106   :  { %v97_v42 = vmul.f32 0.27406862, %v89_v38  ;;  %v98_v43 = vmul.f32 0.27406862, %v90_v39  ;;  %v103_v47 = vmul.f32 0.27406862, %v95_v40 }
 0x107   :  { %v104_v48 = vmul.f32 0.27406862, %v96_v41 }
 0x108   :  { %v101_v45 = vadd.f32 %v99_v44, %v97_v42  ;;  %v102_v46 = vadd.f32 %v100_v32, %v98_v43 }
 0x10a   :  { %v105_v49 = vadd.f32 %v103_v47, %v101_v45  ;;  %v106_v50 = vadd.f32 %v104_v48, %v102_v46 }
 0x10c   :  { %107 = vst [vmem:[#allocation5] sm:$0xff] %v105_v49  ;;  %108 = vst [vmem:[#allocation5 + $0x8] sm:$0xff] %v106_v50 }
 0x10d   :  { %161 = shalt.err (!%p158_p9)
}
 0x10e   :  { %118 = dma.vmem_to_hbm [thread:$0]  %s116_s15, 256, %s209_s1, [#allocation4]  }
 0x10f   :  { %172 = dma.done.wait [#allocation4], 256  }
 0x110   :  { %173 = vsyncadd [#allocation4], 4294967040 }
 0x111   :  { %122 = vsyncpa [#allocation3], 1 }
 0x112   :  { %123 = vsyncpa [#allocation4], 1 }

</bundles_post_ra>
